<compile_context>
chip_gen: v7x
topology: tpu7x:2x2x1
jax: 0.10.0
libtpu: 0.0.40
codegen_flags: <defaults>
</compile_context>

<pallas_src>
import math
import functools

import jax
import jax.numpy as jnp
from jax import lax
from jax.experimental import pallas as pl
from jax.experimental.pallas import tpu as pltpu


def _flash_sdpa_kernel(q_ref, k_ref, v_ref, o_ref, m_sc, l_sc, acc_sc, *,
                       scale, mask, compute_dtype):
    qi = pl.program_id(1)          # query-tile index
    ki = pl.program_id(2)          # kv-tile index (reduction axis)
    nk = pl.num_programs(2)
    tq = q_ref.shape[1]
    tk = k_ref.shape[1]

    @pl.when(ki == 0)
    def _init():
        m_sc[...] = jnp.full(m_sc.shape, -jnp.inf, dtype=jnp.float32)
        l_sc[...] = jnp.zeros(l_sc.shape, dtype=jnp.float32)
        acc_sc[...] = jnp.zeros(acc_sc.shape, dtype=jnp.float32)

    def _update(apply_mask):
        # Pre-scale Q (O(tq*Dk) VPU work instead of O(tq*tk) per step); MXU
        # operands are cast to the compute dtype (bf16 fast path for f32
        # callers) while softmax statistics stay f32.
        q = (q_ref[0] * scale).astype(compute_dtype)         # (tq, Dk)
        k = k_ref[0].astype(compute_dtype)                   # (tk, Dk)
        v = v_ref[0].astype(compute_dtype)                   # (tk, Dv)

        # Q @ K^T without materializing a transpose: contract Dk of both.
        s = lax.dot_general(q, k, dimension_numbers=(((1,), (1,)), ((), ())),
                            preferred_element_type=jnp.float32)   # (tq, tk)

        if apply_mask:
            # Additive causal mask; constant is -1e9 * scale because Q was
            # pre-scaled (preserves PyTorch's mask-before-scale ordering).
            row = qi * tq + lax.broadcasted_iota(jnp.int32, s.shape, 0)
            col = ki * tk + lax.broadcasted_iota(jnp.int32, s.shape, 1)
            s = s + jnp.where(col > row,
                              jnp.float32(-1.0e9 * scale), jnp.float32(0.0))

        # Online-softmax update (f32 statistics, f32 accumulator).
        m_prev = m_sc[...]                                    # (tq, 1)
        m_new = jnp.maximum(m_prev, jnp.max(s, axis=-1, keepdims=True))
        alpha = jnp.exp(m_prev - m_new)
        p = jnp.exp(s - m_new)                                # (tq, tk) f32
        l_sc[...] = alpha * l_sc[...] + jnp.sum(p, axis=-1, keepdims=True)
        acc_sc[...] = alpha * acc_sc[...] + jnp.dot(
            p.astype(compute_dtype), v, preferred_element_type=jnp.float32)
        m_sc[...] = m_new

    if mask:
        # live:     tile is not entirely above the diagonal (something to do).
        # straddle: tile contains masked entries -> build the additive mask;
        #           strictly-below-diagonal tiles take the unmasked branch.
        live = ki * tk < (qi + 1) * tq
        straddle = (ki + 1) * tk - 1 > qi * tq
        pl.when(jnp.logical_and(live, straddle))(lambda: _update(True))
        pl.when(jnp.logical_and(live, jnp.logical_not(straddle)))(
            lambda: _update(False))
    else:
        _update(False)

    @pl.when(ki == nk - 1)
    def _finalize():
        # Fold the softmax denominator into the (tq, Dv) output (EUP recip).
        inv = pl.reciprocal(l_sc[...], approx=True)           # (tq, 1)
        o_ref[0] = (acc_sc[...] * inv).astype(o_ref.dtype)


def _sublane_granule(dtype):
    # Packed dtypes pack along sublanes: 8 rows for 32-bit, 16 for bf16/f16,
    # 32 for int8/fp8.
    return max(8, 32 // jnp.dtype(dtype).itemsize)


def _pick_tile(length, target, granule):
    """Largest tile <= target that divides `length` and is a multiple of
    `granule`, else the full length (full-dim blocks are always legal)."""
    if length <= target or length % granule != 0:
        return length
    t = (target // granule) * granule
    while length % t != 0:
        t -= granule
    return t


def scaled_dot_product_attention(query, keys, values, *, dim_k, mask=False,
                                 bf16_matmul=True):
    B, H, Lq, Dk = query.shape
    Bk, Hk, Lk, Dk2 = keys.shape
    Bv, Hv, Lv, Dv = values.shape
    assert (B, H) == (Bk, Hk) == (Bv, Hv) and Dk == Dk2 and Lk == Lv

    scale = 1.0 / math.sqrt(dim_k)

    # MXU operand dtype: bf16 fast path for f32 callers (full-rate MXU vs
    # multi-pass f32); bf16/f16 callers already feed the MXU natively.
    in_dtype = jnp.dtype(query.dtype)
    compute_dtype = (jnp.bfloat16 if (bf16_matmul and in_dtype == jnp.float32)
                     else query.dtype)

    # Flatten (B, H) -> one "parallel" grid axis (megacore sharding; extent
    # B*H >= 2 so both v7x TensorCores get work).
    BH = B * H
    qf = query.reshape(BH, Lq, Dk)
    kf = keys.reshape(BH, Lk, Dk)
    vf = values.reshape(BH, Lk, Dv)

    # Large tiles so the ~600-cycle per-grid-step overhead is amortized over
    # hundreds of MFLOP of MXU work; blocks stay ~2 MiB double-buffered.
    granule = _sublane_granule(in_dtype)
    tq = _pick_tile(Lq, 512, granule)
    tk = _pick_tile(Lk, 1024, granule)
    nq, nk = Lq // tq, Lk // tk

    q_map = lambda b, qi, ki: (b, qi, 0)
    o_map = lambda b, qi, ki: (b, qi, 0)
    if mask:
        # Clamp the kv block index so fully-above-diagonal steps (compute is
        # skipped by pl.when) re-use the already-resident diagonal block
        # instead of DMAing a tile that is never read.
        def kv_map(b, qi, ki):
            last_live = ((qi + 1) * tq - 1) // tk
            return (b, jnp.minimum(ki, last_live), 0)
    else:
        kv_map = lambda b, qi, ki: (b, ki, 0)

    kernel = functools.partial(_flash_sdpa_kernel, scale=scale, mask=mask,
                               compute_dtype=compute_dtype)

    # TODO(synk): for head dims < 128 (Dv=32 in this demo) the finalize store
    # is not lane-dense; packing several heads along the lane axis would fix
    # it but needs an in-kernel relayout that is not worth it at production
    # head dims >= 128.
    # TODO(synk): if v5e profiling shows exposed K/V DMA after the causal
    # clamp, add pipeline_mode=pl.Buffered(3) on the K/V BlockSpecs.
    grid_spec = pltpu.PrefetchScalarGridSpec(
        num_scalar_prefetch=0,
        grid=(BH, nq, nk),
        in_specs=[
            pl.BlockSpec((1, tq, Dk), q_map),
            pl.BlockSpec((1, tk, Dk), kv_map),
            pl.BlockSpec((1, tk, Dv), kv_map),
        ],
        out_specs=pl.BlockSpec((1, tq, Dv), o_map),
        scratch_shapes=[
            pltpu.VMEM((tq, 1), jnp.float32),    # running max m
            pltpu.VMEM((tq, 1), jnp.float32),    # running denom l
            pltpu.VMEM((tq, Dv), jnp.float32),   # output accumulator
        ],
    )

    # Scoped-VMEM budget: double-buffered blocks + scratch (the (tq,1) stats
    # pad to 128 lanes).  Only override the default when needed and respect
    # the per-generation physical capacity (64 MiB/TC on v7x vs 128 MiB on
    # v5e/v6e) via get_tpu_info.
    itemsize = in_dtype.itemsize
    block_bytes = itemsize * (tq * Dk + tk * Dk + tk * Dv + tq * Dv)
    scratch_bytes = 4 * (tq * Dv + 2 * tq * 128)
    vmem_est = 2 * block_bytes + scratch_bytes
    cp_kwargs = dict(dimension_semantics=("parallel", "parallel", "arbitrary"))
    if vmem_est > 16 * 1024 * 1024:     # smallest default scoped limit (v5e)
        try:
            cap = int(pltpu.get_tpu_info().vmem_capacity_bytes)
        except Exception:
            cap = 64 * 1024 * 1024      # conservative fallback: v7x per-TC
        cp_kwargs["vmem_limit_bytes"] = min(int(vmem_est * 1.5), cap * 3 // 4)

    out = pl.pallas_call(
        kernel,
        out_shape=jax.ShapeDtypeStruct((BH, Lq, Dv), query.dtype),
        grid_spec=grid_spec,
        compiler_params=pltpu.CompilerParams(**cp_kwargs),
    )(qf, kf, vf)

    return out.reshape(B, H, Lq, Dv)


def _reference(query, keys, values, *, dim_k, mask=False):
    s = jnp.einsum("bhqd,bhkd->bhqk", query, keys)
    if mask:
        lq, lk = s.shape[-2:]
        tri = jnp.triu(jnp.full((lq, lk), -1.0e9, dtype=s.dtype), k=1)
        s = s + tri
    s = s / math.sqrt(dim_k)
    p = jax.nn.softmax(s, axis=-1)
    return jnp.einsum("bhqk,bhkd->bhqd", p, values)


if __name__ == "__main__":
    B, H, L, Dk, Dv = 2, 4, 8, 32, 32

    key = jax.random.PRNGKey(0)
    kq, kk, kv = jax.random.split(key, 3)
    query = jax.random.normal(kq, (B, H, L, Dk), dtype=jnp.float32)
    keys_ = jax.random.normal(kk, (B, H, L, Dk), dtype=jnp.float32)
    values = jax.random.normal(kv, (B, H, L, Dv), dtype=jnp.float32)

    # Tolerance accounts for the bf16 MXU operand fast path (f32 accumulation
    # preserved) plus the approximate EUP reciprocal used for the softmax
    # normalization.
    ATOL = RTOL = 2e-2

    # unmasked
    out = scaled_dot_product_attention(query, keys_, values, dim_k=Dk, mask=False)
    out = jax.block_until_ready(out)
    ref = _reference(query, keys_, values, dim_k=Dk, mask=False)
    assert out.shape == ref.shape
    assert jnp.allclose(out, ref, atol=ATOL, rtol=RTOL), "unmasked mismatch"

    # causal-masked
    out_m = scaled_dot_product_attention(query, keys_, values, dim_k=Dk, mask=True)
    out_m = jax.block_until_ready(out_m)
    ref_m = _reference(query, keys_, values, dim_k=Dk, mask=True)
    assert jnp.allclose(out_m, ref_m, atol=ATOL, rtol=RTOL), "masked mismatch"

    print("KERNEL_OK")
</pallas_src>

<mosaic_0001>
module attributes {stable_mosaic.version = 11 : i64} {
  func.func @_flash_sdpa_kernel(%arg0: i32, %arg1: i32, %arg2: i32, %arg3: memref<1x8x32xf32, #tpu.memory_space<vmem>>, %arg4: memref<1x8x32xf32, #tpu.memory_space<vmem>>, %arg5: memref<1x8x32xf32, #tpu.memory_space<vmem>>, %arg6: memref<1x8x32xf32, #tpu.memory_space<vmem>>, %arg7: memref<8x1xf32, #tpu.memory_space<vmem>>, %arg8: memref<8x1xf32, #tpu.memory_space<vmem>>, %arg9: memref<8x32xf32, #tpu.memory_space<vmem>>) attributes {dimension_semantics = [#tpu.dimension_semantics<parallel>, #tpu.dimension_semantics<parallel>, #tpu.dimension_semantics<arbitrary>], iteration_bounds = array<i64: 8, 1, 1>, scalar_prefetch = 0 : i64, scratch_operands = 3 : i64, tpu.core_type = #tpu.core_type<tc>, window_params = [{transform_indices = @transform_0, window_bounds = array<i64: 1, 8, 32>}, {transform_indices = @transform_1, window_bounds = array<i64: 1, 8, 32>}, {transform_indices = @transform_2, window_bounds = array<i64: 1, 8, 32>}, {transform_indices = @transform_3, window_bounds = array<i64: 1, 8, 32>}]} {
    %c0_i32 = arith.constant 0 : i32
    %0 = arith.cmpi eq, %arg2, %c0_i32 : i32
    %1 = arith.extui %0 : i1 to i32
    %c0_i32_0 = arith.constant 0 : i32
    %2 = arith.cmpi ne, %1, %c0_i32_0 : i32
    scf.if %2 {
      %cst_27 = arith.constant 0xFF800000 : f32
      %41 = vector.broadcast %cst_27 : f32 to vector<8x1xf32>
      %c0_28 = arith.constant 0 : index
      %c0_29 = arith.constant 0 : index
      %42 = vector.load %arg7[%c0_28, %c0_29] : memref<8x1xf32, #tpu.memory_space<vmem>>, vector<8x1xf32>
      tpu.vector_store %arg7[%c0_28, %c0_29], %41 {strides = array<i32>} : memref<8x1xf32, #tpu.memory_space<vmem>>, vector<8x1xf32>,
      %cst_30 = arith.constant 0.000000e+00 : f32
      %43 = vector.broadcast %cst_30 : f32 to vector<8x1xf32>
      %c0_31 = arith.constant 0 : index
      %c0_32 = arith.constant 0 : index
      %44 = vector.load %arg8[%c0_31, %c0_32] : memref<8x1xf32, #tpu.memory_space<vmem>>, vector<8x1xf32>
      tpu.vector_store %arg8[%c0_31, %c0_32], %43 {strides = array<i32>} : memref<8x1xf32, #tpu.memory_space<vmem>>, vector<8x1xf32>,
      %cst_33 = arith.constant 0.000000e+00 : f32
      %45 = vector.broadcast %cst_33 : f32 to vector<8x32xf32>
      %c0_34 = arith.constant 0 : index
      %c0_35 = arith.constant 0 : index
      %46 = vector.load %arg9[%c0_34, %c0_35] : memref<8x32xf32, #tpu.memory_space<vmem>>, vector<8x32xf32>
      tpu.vector_store %arg9[%c0_34, %c0_35], %45 {strides = array<i32>} : memref<8x32xf32, #tpu.memory_space<vmem>>, vector<8x32xf32>,
    } else {
    }
    %c0 = arith.constant 0 : index
    %c0_1 = arith.constant 0 : index
    %c0_2 = arith.constant 0 : index
    %3 = vector.load %arg3[%c0, %c0_1, %c0_2] : memref<1x8x32xf32, #tpu.memory_space<vmem>>, vector<1x8x32xf32>
    %4 = vector.shape_cast %3 : vector<1x8x32xf32> to vector<8x32xf32>
    %cst = arith.constant 0.176776692 : f32
    %5 = vector.broadcast %cst : f32 to vector<8x32xf32>
    %6 = arith.mulf %4, %5 : vector<8x32xf32>
    %7 = arith.truncf %6 : vector<8x32xf32> to vector<8x32xbf16>
    %c0_3 = arith.constant 0 : index
    %c0_4 = arith.constant 0 : index
    %c0_5 = arith.constant 0 : index
    %8 = vector.load %arg4[%c0_3, %c0_4, %c0_5] : memref<1x8x32xf32, #tpu.memory_space<vmem>>, vector<1x8x32xf32>
    %9 = vector.shape_cast %8 : vector<1x8x32xf32> to vector<8x32xf32>
    %10 = arith.truncf %9 : vector<8x32xf32> to vector<8x32xbf16>
    %c0_6 = arith.constant 0 : index
    %c0_7 = arith.constant 0 : index
    %c0_8 = arith.constant 0 : index
    %11 = vector.load %arg5[%c0_6, %c0_7, %c0_8] : memref<1x8x32xf32, #tpu.memory_space<vmem>>, vector<1x8x32xf32>
    %12 = vector.shape_cast %11 : vector<1x8x32xf32> to vector<8x32xf32>
    %13 = arith.truncf %12 : vector<8x32xf32> to vector<8x32xbf16>
    %cst_9 = arith.constant dense<0.000000e+00> : vector<8x8xf32>
    %14 = tpu.matmul %7, %10, %cst_9 {dimension_numbers = #tpu.dot_dimension_numbers<[1], [1], [0], [0], [0, 0, 1, 0], [], []>} : vector<8x32xbf16>, vector<8x32xbf16>, vector<8x8xf32> -> vector<8x8xf32>
    %c0_10 = arith.constant 0 : index
    %c0_11 = arith.constant 0 : index
    %15 = vector.load %arg7[%c0_10, %c0_11] : memref<8x1xf32, #tpu.memory_space<vmem>>, vector<8x1xf32>
    %cst_12 = arith.constant dense<0xFF800000> : vector<8xf32>
    %16 = vector.multi_reduction <maximumf>, %14, %cst_12 [1] : vector<8x8xf32> to vector<8xf32>
    %17 = vector.shape_cast %16 : vector<8xf32> to vector<8x1xf32>
    %18 = arith.maximumf %15, %17 : vector<8x1xf32>
    %19 = arith.subf %15, %18 : vector<8x1xf32>
    %20 = math.exp %19 : vector<8x1xf32>
    %21 = vector.broadcast %18 : vector<8x1xf32> to vector<8x8xf32>
    %22 = arith.subf %14, %21 : vector<8x8xf32>
    %23 = math.exp %22 : vector<8x8xf32>
    %c0_13 = arith.constant 0 : index
    %c0_14 = arith.constant 0 : index
    %24 = vector.load %arg8[%c0_13, %c0_14] : memref<8x1xf32, #tpu.memory_space<vmem>>, vector<8x1xf32>
    %25 = arith.mulf %20, %24 : vector<8x1xf32>
    %cst_15 = arith.constant dense<0.000000e+00> : vector<8xf32>
    %26 = vector.multi_reduction <add>, %23, %cst_15 [1] : vector<8x8xf32> to vector<8xf32>
    %27 = vector.shape_cast %26 : vector<8xf32> to vector<8x1xf32>
    %28 = arith.addf %25, %27 : vector<8x1xf32>
    %c0_16 = arith.constant 0 : index
    %c0_17 = arith.constant 0 : index
    %29 = vector.load %arg8[%c0_16, %c0_17] : memref<8x1xf32, #tpu.memory_space<vmem>>, vector<8x1xf32>
    tpu.vector_store %arg8[%c0_16, %c0_17], %28 {strides = array<i32>} : memref<8x1xf32, #tpu.memory_space<vmem>>, vector<8x1xf32>,
    %c0_18 = arith.constant 0 : index
    %c0_19 = arith.constant 0 : index
    %30 = vector.load %arg9[%c0_18, %c0_19] : memref<8x32xf32, #tpu.memory_space<vmem>>, vector<8x32xf32>
    %31 = vector.broadcast %20 : vector<8x1xf32> to vector<8x32xf32>
    %32 = arith.mulf %31, %30 : vector<8x32xf32>
    %33 = arith.truncf %23 : vector<8x8xf32> to vector<8x8xbf16>
    %cst_20 = arith.constant dense<0.000000e+00> : vector<8x32xf32>
    %34 = tpu.matmul %33, %13, %cst_20 {dimension_numbers = #tpu.dot_dimension_numbers<[1], [0], [0], [1], [0, 0, 1, 1], [], []>} : vector<8x8xbf16>, vector<8x32xbf16>, vector<8x32xf32> -> vector<8x32xf32>
    %35 = arith.addf %32, %34 : vector<8x32xf32>
    %c0_21 = arith.constant 0 : index
    %c0_22 = arith.constant 0 : index
    %36 = vector.load %arg9[%c0_21, %c0_22] : memref<8x32xf32, #tpu.memory_space<vmem>>, vector<8x32xf32>
    tpu.vector_store %arg9[%c0_21, %c0_22], %35 {strides = array<i32>} : memref<8x32xf32, #tpu.memory_space<vmem>>, vector<8x32xf32>,
    %c0_23 = arith.constant 0 : index
    %c0_24 = arith.constant 0 : index
    %37 = vector.load %arg7[%c0_23, %c0_24] : memref<8x1xf32, #tpu.memory_space<vmem>>, vector<8x1xf32>
    tpu.vector_store %arg7[%c0_23, %c0_24], %18 {strides = array<i32>} : memref<8x1xf32, #tpu.memory_space<vmem>>, vector<8x1xf32>,
    %c0_i32_25 = arith.constant 0 : i32
    %38 = arith.cmpi eq, %arg2, %c0_i32_25 : i32
    %39 = arith.extui %38 : i1 to i32
    %c0_i32_26 = arith.constant 0 : i32
    %40 = arith.cmpi ne, %39, %c0_i32_26 : i32
    scf.if %40 {
      %c0_27 = arith.constant 0 : index
      %c0_28 = arith.constant 0 : index
      %41 = vector.load %arg8[%c0_27, %c0_28] : memref<8x1xf32, #tpu.memory_space<vmem>>, vector<8x1xf32>
      %42 = tpu.reciprocal %41 {approx = true} : vector<8x1xf32> -> vector<8x1xf32>
      %c0_29 = arith.constant 0 : index
      %c0_30 = arith.constant 0 : index
      %43 = vector.load %arg9[%c0_29, %c0_30] : memref<8x32xf32, #tpu.memory_space<vmem>>, vector<8x32xf32>
      %44 = vector.broadcast %42 : vector<8x1xf32> to vector<8x32xf32>
      %45 = arith.mulf %43, %44 : vector<8x32xf32>
      %c0_31 = arith.constant 0 : index
      %c0_32 = arith.constant 0 : index
      %c0_33 = arith.constant 0 : index
      %46 = vector.load %arg6[%c0_31, %c0_32, %c0_33] : memref<1x8x32xf32, #tpu.memory_space<vmem>>, vector<1x8x32xf32>
      %47 = vector.shape_cast %46 : vector<1x8x32xf32> to vector<8x32xf32>
      %48 = vector.shape_cast %45 : vector<8x32xf32> to vector<1x8x32xf32>
      tpu.vector_store %arg6[%c0_31, %c0_32, %c0_33], %48 {strides = array<i32>} : memref<1x8x32xf32, #tpu.memory_space<vmem>>, vector<1x8x32xf32>,
    } else {
    }
    return
  }
  func.func @transform_0(%arg0: i32, %arg1: i32, %arg2: i32) -> (i32, i32, i32) {
    %c0_i32 = arith.constant 0 : i32
    %c0_i32_0 = arith.constant 0 : i32
    return %arg0, %arg1, %c0_i32 : i32, i32, i32
  }
  func.func @transform_1(%arg0: i32, %arg1: i32, %arg2: i32) -> (i32, i32, i32) {
    %c0_i32 = arith.constant 0 : i32
    %c0_i32_0 = arith.constant 0 : i32
    return %arg0, %arg2, %c0_i32 : i32, i32, i32
  }
  func.func @transform_2(%arg0: i32, %arg1: i32, %arg2: i32) -> (i32, i32, i32) {
    %c0_i32 = arith.constant 0 : i32
    %c0_i32_0 = arith.constant 0 : i32
    return %arg0, %arg2, %c0_i32 : i32, i32, i32
  }
  func.func @transform_3(%arg0: i32, %arg1: i32, %arg2: i32) -> (i32, i32, i32) {
    %c0_i32 = arith.constant 0 : i32
    %c0_i32_0 = arith.constant 0 : i32
    return %arg0, %arg1, %c0_i32 : i32, i32, i32
  }
}

</mosaic_0001>

<bundles_post_ra>
// kernel: tpu_custom_call.1
= control target key start
LH: loop header
LB: loop body
LE: loop exit
PB: predicated region body
PF: predicated region fallthrough
CT: control target
= control target key end

     0   :  { %s1191_s0 = inlined_call_operand.hbm [shape: f32[8,8,32], index: 0, kind: input, shape index: {}]   ;;  %s1192_s1 = inlined_call_operand.hbm [shape: f32[8,8,32], index: 1, kind: input, shape index: {}]   ;;  %s1193_s2 = inlined_call_operand.hbm [shape: f32[8,8,32], index: 2, kind: input, shape index: {}]   ;;  %s1194_s3 = inlined_call_operand.hbm [shape: f32[8,8,32], index: 3, kind: output, shape index: {}]  }
   0x1   :  { %1200 = sst [smem:[#allocation18_spill]] %s1192_s1 }
   0x2   :  { %8 = vsyncpa [#allocation6], 0 }
   0x3   :  { %10 = vsyncpa [#allocation6 + $0x1], 0 }
   0x4   :  { %11 = vsyncpa [#allocation9], 0 }
   0x5   :  { %13 = vsyncpa [#allocation9 + $0x1], 0 }
   0x6   :  { %14 = vsyncpa [#allocation7], 0 }
   0x7   :  { %16 = vsyncpa [#allocation7 + $0x1], 0  ;;  %s917_s12 = smov 0   ;;  %s919_s13 = smov 0  }
   0x8   :  { %s921_s14 = smov 0   ;;  %s923_s15 = smov 0  }
   0x9   :  { %s925_s16 = smov 0   ;;  %s927_s17 = smov 0  }
   0xa LB: > { %1201 = sst [smem:[#allocation15_spill]] %s883_s16  ;;  %s948_s18 = sadd.s32 4294967295, %s887_s17   ;;  %s887_s17 = sphi %s927_s17, %s22_s17   ;;  %s883_s16 = sphi %s925_s16, %s1221_s16   ;;  %s879_s15 = sphi %s923_s15, %s1220_s15   ;;  %s875_s14 = sphi %s921_s14, %s1224_s14   ;;  %s871_s13 = sphi %s919_s13, %s1223_s13   ;;  %s867_s12 = sphi %s917_s12, %s1222_s12  }
   0xb   : > { %s591_s19 = sadd.s32 4294967294, %s887_s17   ;;  %s41_s20 = sadd.s32 1, %s883_s16 }
   0xc   : > { %s50_s21 = sadd.s32 1, %s875_s14  ;;  %p43_p0 = scmp.ge.s32.totalorder %s41_s20, 8 }
   0xd   : > { %p57_p1 = scmp.ne.s32.totalorder %s875_s14, %s871_s13  ;;  %p58_p2 = scmp.eq.s32.totalorder %s887_s17, 0 }
   0xe   : > { %p63_p3 = scmp.ne.s32.totalorder %s871_s13, %s867_s12  ;;  %s1226_s20 = smov (%p43_p0, %s41_s20), 0 }
   0xf   : > { %1202 = sst [smem:[#allocation16_spill]] %s1226_s20  ;;  %p960_p4 = por %p58_p2, %p57_p1 }
  0x10   : > { %p64_p5 = scmp.eq.s32.totalorder %s948_s18, 0  ;;  %s45_s23 = ssub.s32 %s883_s16, %s1226_s20 }
  0x11   : > { %p145_p6 = scmp.eq.s32.totalorder %s948_s18, 7  ;;  %p48_p7 = scmp.eq.s32.totalorder %s45_s23, 0 }
  0x12   : > { %p968_p8 = por %p64_p5, %p63_p3  ;;  %p151_p10 = scmp.eq.s32.totalorder %s591_s19, 7 }
  0x13   : > { %p972_p9 = por %p145_p6, %p57_p1  ;;  %p649_p12 = scmp.lt.s32.totalorder %s887_s17, 8 }
  0x14   : > { %s1204_s24 = scalar_select %p968_p8, 1, 0 }
  0x15   : > { %s1205_s25 = scalar_select %p972_p9, 1, 0 }
  0x16   : > { %s977_s26 = scalar_select %p48_p7, %s875_s14, %s50_s21  }
  0x17   : > { %p979_p11 = por %p151_p10, %p63_p3  ;;  %s171_s28 = sand.u32 1, %s875_s14  }
  0x18   : > { %1206 = sst [smem:[#allocation17_spill]] %s977_s26  ;;  %s987_s29 = sshll.u32 %s171_s28, 3 }
  0x19   : > { %s1207_s27 = scalar_select %p979_p11, 1, 0 }
  0x1a   : > { %s990_s30 = sshll.u32 %s883_s16, 7  ;;  %p994_p13 = pnand %p649_p12, %p960_p4 }
  0x1b   : > { %s190_s5 = sand.u32 1, %s887_s17   ;;  %s1209_s1 = sld [smem:[#allocation18_spill]] }
  0x1c   : > { %s1208_s4 = scalar_select %p994_p13, 1, 0 }
  0x1d   : > { %s194_s9 = scalar_lea.vmem [#allocation8], %s987_s29  ;;  %s1010_s11 = scalar_lea.sflag [#allocation9], %s190_s5 }
  0x1e   : > { %s202_s10 = sshll.u32 %s194_s9, 4  ;;  %p1016_p3 = pneg %p994_p13  ;;  %s1007_s10 = int_to_ptr.vmem [resolvable:$true] %s202_s10 }
  0x21   : > { %s1003_s8 = scalar_lea.hbm %s1209_s1, %s990_s30  ;;  %s716_s6 = scalar_lea.hbm %s1209_s1, 1024 }
  0x22   : > { %s711_s19 = scalar_lea.hbm %s1003_s8, 128  ;;  %p717_p6 = scmp.lt.u32.totalorder %s1003_s8, %s1209_s1 }
  0x23   : > { %p712_p2 = scmp.ne.s32.totalorder %s1003_s8, %s711_s19  ;;  %p718_p7 = scmp.lt.u32.totalorder %s716_s6, %s711_s19 }
  0x24   : > { %p720_p12 = scmp.lt.u32.totalorder %s711_s19, %s1003_s8 }
  0x25   : > { %p714_p4 = pnand %p1016_p3, %p712_p2  ;;  %p719_p10 = por %p718_p7, %p717_p6 }
  0x27   : > { %p715_p5 = pneg %p714_p4  ;;  %p721_p0 = por %p720_p12, %p719_p10 }
  0x29   : > { %p722_p1 = pnand %p721_p0, %p715_p5 }
  0x2b   : > { %725 = shalt.err (!%p722_p1)
}
  0x2c   : > { %s726_s5 = scalar_lea.vmem %s1007_s10, 128  ;;  %s889_s22 = smov [#allocation8]  }
  0x2d   : > { %p727_p2 = scmp.ne.s32.totalorder %s1007_s10, %s726_s5  ;;  %s731_s23 = sshll.u32 %s889_s22, 4  ;;  %s732_s23 = int_to_ptr.vmem [resolvable:$false] %s731_s23 }
  0x2e   : > { %s733_s7 = scalar_lea.vmem %s732_s23, 256  ;;  %p734_p9 = scmp.lt.s32.totalorder %s1007_s10, %s732_s23 }
  0x2f   : > { %p729_p4 = pnand %p727_p2, %p1016_p3  ;;  %p735_p8 = scmp.lt.s32.totalorder %s733_s7, %s726_s5 }
  0x31   : > { %p730_p11 = pneg %p729_p4  ;;  %p736_p6 = por %p735_p8, %p734_p9 }
  0x33   : > { %p737_p7 = pnand %p736_p6, %p730_p11 }
  0x35   : > { %740 = shalt.err (!%p737_p7)
}
  0x36   : > { %641 = dma.hbm_to_vmem [thread:$0]  (!%p994_p13), %s1003_s8, 128, %s1007_s10, %s1010_s11  }
  0x37   : > { %p1211_p0 = scmp.lt.s32.totalorder %s887_s17, 9  ;;  %p1212_p1 = scmp.ge.s32.totalorder %s887_s17, 1 }
  0x38   : > { %s1052_s5 = scalar_lea.hbm %s1191_s0, %s990_s30  ;;  %s175_s22 = scalar_lea.vmem [#allocation5], %s987_s29 }
  0x39   : > { %p1044_p5 = pnand %p1212_p1, %p1211_p0  ;;  %s183_s23 = sshll.u32 %s175_s22, 4  ;;  %s1055_s23 = int_to_ptr.vmem [resolvable:$true] %s183_s23 }
  0x3a   : > { %s1061_s7 = scalar_lea.hbm %s1193_s2, %s990_s30  ;;  %s172_s1 = scalar_lea.sflag [#allocation6], %s171_s28 }
  0x3b   : > { %s1213_s19 = scalar_select %p1044_p5, 1, 0 }
  0x3c   : > { %s741_s20 = scalar_lea.hbm %s1052_s5, 128  ;;  %s746_s16 = scalar_lea.hbm %s1191_s0, 1024 }
  0x3d   : > { %p742_p8 = scmp.ne.s32.totalorder %s1052_s5, %s741_s20  ;;  %p747_p10 = scmp.lt.u32.totalorder %s1052_s5, %s1191_s0 }
  0x3e   : > { %p748_p12 = scmp.lt.u32.totalorder %s746_s16, %s741_s20  ;;  %p750_p4 = scmp.lt.u32.totalorder %s741_s20, %s1052_s5 }
  0x3f   : > { %p744_p9 = pnand %p742_p8, %p1016_p3 }
  0x40   : > { %p749_p2 = por %p748_p12, %p747_p10 }
  0x41   : > { %p745_p11 = pneg %p744_p9 }
  0x42   : > { %p751_p6 = por %p750_p4, %p749_p2 }
  0x44   : > { %p752_p7 = pnand %p751_p6, %p745_p11 }
  0x46   : > { %755 = shalt.err (!%p752_p7)
}
  0x47   : > { %s756_s28 = scalar_lea.vmem %s1055_s23, 128  ;;  %s890_s30 = smov [#allocation5]  }
  0x48   : > { %p757_p0 = scmp.ne.s32.totalorder %s1055_s23, %s756_s28  ;;  %s761_s8 = sshll.u32 %s890_s30, 4  ;;  %s762_s8 = int_to_ptr.vmem [resolvable:$false] %s761_s8 }
  0x49   : > { %s763_s26 = scalar_lea.vmem %s762_s8, 256  ;;  %p764_p9 = scmp.lt.s32.totalorder %s1055_s23, %s762_s8 }
  0x4a   : > { %p759_p1 = pnand %p757_p0, %p1016_p3  ;;  %p765_p5 = scmp.lt.s32.totalorder %s763_s26, %s756_s28 }
  0x4c   : > { %p760_p8 = pneg %p759_p1  ;;  %p766_p10 = por %p765_p5, %p764_p9 }
  0x4e   : > { %p767_p12 = pnand %p766_p10, %p760_p8 }
  0x50   : > { %770 = shalt.err (!%p767_p12)
}
  0x51   : > { %638 = dma.hbm_to_vmem [thread:$0]  (!%p994_p13), %s1052_s5, 128, %s1055_s23, %s172_s1  }
  0x52   : > { %s213_s16 = scalar_lea.vmem [#allocation10], %s987_s29  ;;  %s771_s10 = scalar_lea.hbm %s1061_s7, 128 }
  0x53   : > { %s221_s20 = sshll.u32 %s213_s16, 4  ;;  %p772_p11 = scmp.ne.s32.totalorder %s1061_s7, %s771_s10  ;;  %s222_s20 = int_to_ptr.vmem [resolvable:$true] %s221_s20 }
  0x54   : > { %s776_s22 = scalar_lea.hbm %s1193_s2, 1024  ;;  %p777_p4 = scmp.lt.u32.totalorder %s1061_s7, %s1193_s2 }
  0x55   : > { %p774_p5 = pnand %p772_p11, %p1016_p3  ;;  %p778_p6 = scmp.lt.u32.totalorder %s776_s22, %s771_s10 }
  0x56   : > { %p780_p0 = scmp.lt.u32.totalorder %s771_s10, %s1061_s7 }
  0x57   : > { %p775_p2 = pneg %p774_p5  ;;  %p779_p7 = por %p778_p6, %p777_p4 }
  0x59   : > { %p781_p1 = por %p780_p0, %p779_p7 }
  0x5b   : > { %p782_p8 = pnand %p781_p1, %p775_p2 }
  0x5d   : > { %785 = shalt.err (!%p782_p8)
}
  0x5e   : > { %s786_s1 = scalar_lea.vmem %s222_s20, 128  ;;  %s891_s29 = smov [#allocation10]  }
  0x5f   : > { %p787_p9 = scmp.ne.s32.totalorder %s222_s20, %s786_s1  ;;  %s791_s5 = sshll.u32 %s891_s29, 4  ;;  %s792_s5 = int_to_ptr.vmem [resolvable:$false] %s791_s5 }
  0x60   : > { %s793_s23 = scalar_lea.vmem %s792_s5, 256  ;;  %p794_p11 = scmp.lt.s32.totalorder %s222_s20, %s792_s5 }
  0x61   : > { %p789_p10 = pnand %p787_p9, %p1016_p3  ;;  %p795_p5 = scmp.lt.s32.totalorder %s793_s23, %s786_s1 }
  0x63   : > { %p790_p12 = pneg %p789_p10  ;;  %p796_p13 = por %p795_p5, %p794_p11 }
  0x65   : > { %p797_p4 = pnand %p796_p13, %p790_p12 }
  0x67   : > { %800 = shalt.err (!%p797_p4)
}
  0x68   : > { %p1214_p6 = scmp.ne.s32.totalorder %s1208_s4, 0  ;;  %p1215_p2 = scmp.ne.s32.totalorder %s1213_s19, 0 }
  0x69   : > { %s1108_s21 = sand.u32 (!%p1215_p2), 1, %s871_s13   ;;  %p1216_p13 = scmp.ne.s32.totalorder (!%p1215_p2), %s1204_s24, 0 }
  0x6a   : > { %644 = dma.hbm_to_vmem [thread:$0]  (!%p1214_p6), %s1061_s7, 128, %s222_s20, %s1010_s11  }
  0x6b   : > { %230 = sbr.rel (%p1215_p2) target bundleno = 937 (0x3a9), region = 32  ;;  %s1111_s8 = sshll.u32 (!%p1215_p2), %s1108_s21, 3 }
  0x6c   : > { %s233_s26 = scalar_lea.sflag (!%p1215_p2), [#allocation6], %s1108_s21  ;;  %s236_s16 = scalar_lea.vmem (!%p1215_p2), [#allocation5], %s1111_s8 }
  0x72   : > { %854 = dma.done.wait (%p1216_p13), %s233_s26, 128  }
  0x73   : > { %856 = vsyncadd (%p1216_p13), %s233_s26, 4294967168  ;;  %s241_s4 = sand.u32 1, %s948_s18   ;;  %s245_s19 = scalar_lea.vmem [#allocation8], %s1111_s8 }
  0x74   : > { %s242_s11 = scalar_lea.sflag [#allocation9], %s241_s4 }
  0x75   : > { %858 = dma.done.wait (%p1216_p13), %s242_s11, 256  }
  0x76   : > { %860 = vsyncadd (%p1216_p13), %s242_s11, 4294967040  ;;  %vm295_vm0 = vcmask 261120   ;;  %v892_v0 = vmov 0.0   ;;  %vm893_vm1 = vmmov 0   ;;  %v300_v1 = vld [vmem:[%s245_s19] sm:$0xff]  ;;  %v297_v2 = vld [vmem:[%s236_s16] sm:$0xff] }
  0x77   : > { %615 = vmatprep.subr.bf16.mxu0 %v892_v0  ;;  %296 = vst.msk [vmem:[#allocation4] sm:$0xff] %vm295_vm0, %v892_v0  ;;  %617 = vmatprep.mubr.msk.bf16.mxu0 %vm893_vm1, %v892_v0  ;;  %v301_v3 = vpack.c.bf16 %v300_v1, %v300_v1  ;;  %v298_v5 = vmul.f32 0.17677669, %v297_v2  ;;  %vm292_vm2 = vcmask 7168   ;;  %v894_v7 = vmov -inf   ;;  %s254_s18 = scalar_lea.vmem [#allocation10], %s1111_s8 }
  0x78   : > { %621 = vmatprep.subr.bf16.mxu1 %v892_v0  ;;  %623 = vmatprep.mubr.msk.bf16.mxu1 %vm893_vm1, %v892_v0  ;;  %293 = vst.msk [vmem:[#allocation2] sm:$0xff] %vm292_vm2, %v894_v7  ;;  %294 = vst.msk [vmem:[#allocation3] sm:$0xff] %vm292_vm2, %v892_v0  ;;  %vm352_vm3 = vcmask 64512   ;;  %v895_v13 = vmov 0   ;;  %v302_v18 = vld [vmem:[%s254_s18] sm:$0xff]  ;;  %vm387_vm4 = vcmask 1043456  }
  0x79   : > { %v309_v4 = vsel %vm295_vm0, %v301_v3, 0  ;;  %v299_v6 = vpack.c.bf16 %v298_v5, %v298_v5  ;;  %703 = vset.pattern.permute.xlu0 %v895_v13  ;;  %704 = vset.pattern.permute.xlu1 %v895_v13  ;;  %v303_v19 = vpack.c.bf16 %v302_v18, %v302_v18  ;;  %s608_s24 = sshll.u32 %s879_s15, 7  ;;  %s286_s7 = scalar_lea.vmem [#allocation11], %s1111_s8 }
  0x7a   : > { %616 = vmatpush3.bf16.xpose.msra.mxu0 %v309_v4  ;;  %s462_s20 = sshll.u32 %s286_s7, 4  ;;  %s1142_s9 = scalar_lea.hbm %s1194_s3, %s608_s24  ;;  %s1144_s20 = int_to_ptr.vmem [resolvable:$true] %s462_s20 }
  0x7b   : > { %v389_v20 = vsel %vm387_vm4, %v303_v19, 0  ;;  %s448_s22 = scalar_lea.sflag [#allocation7], %s1108_s21  ;;  %s801_s28 = scalar_lea.vmem %s1144_s20, 128 }
  0x7c   : > { %622 = vmatpush3.bf16.msra.mxu1 %v389_v20  ;;  %p802_p3 = scmp.ne.s32.totalorder %s1144_s20, %s801_s28  ;;  %p1217_p7 = scmp.ne.s32.totalorder %s1205_s25, 0 }
  0x7d   : > { %s896_s15 = smov [#allocation11]  }
  0x7e   : > { %v376_v35 = vld [vmem:[#allocation4] sm:$0xff]  ;;  %p803_p0 = pnand %p802_p3, %p1217_p7  ;;  %s805_s30 = sshll.u32 %s896_s15, 4  ;;  %s806_s30 = int_to_ptr.vmem [resolvable:$false] %s805_s30 }
  0x7f   : > { %v351_v14 = vld [vmem:[#allocation2] sm:$0xff]  ;;  %v368_v29 = vld [vmem:[#allocation3] sm:$0xff]  ;;  %s807_s1 = scalar_lea.vmem %s806_s30, 256  ;;  %p808_p8 = scmp.lt.s32.totalorder %s1144_s20, %s806_s30 }
  0x80   : > { %p804_p1 = pneg %p803_p0  ;;  %p809_p9 = scmp.lt.s32.totalorder %s807_s1, %s801_s28 }
  0x81   : > { %618 = vmatmul.mubr.msk.bf16.vlgmr.msra.gmra.mrb[0].mxu0 %vm295_vm0, %v299_v6 }
  0x82   : > { %p810_p10 = por %p809_p9, %p808_p8 }
  0x84   : > { %p811_p12 = pnand %p810_p10, %p804_p1 }
 0x154   : > { %v345_v8 = vpop.f32.mrb[0].mxu0 }
 0x155   : > { %v619_v9 = vpop.f32.mrb[1].mxu0  ;;  %v353_v10 = vsel %vm352_vm3, %v345_v8, -inf }
 0x156   : > { %354 = vmax.xlane.f32.xlu0 %v353_v10  ;;  %v348_v11 = vpop.f32.mrb[2].mxu0 }
 0x157   : > { %v620_v12 = vpop.f32.mrb[3].mxu0 }
 0x1e3   : > { %v355_v15 = vpop.xlane.xlu0 %354 }
 0x1e4   : > { %v356_v16 = vmax.f32 %v351_v14, %v355_v15 }
 0x1e6   : > { %v357_v17 = vsub.f32 %v351_v14, %v356_v16  ;;  %433 = vst.msk [vmem:[#allocation2] sm:$0xff] %vm292_vm2, %v356_v16  ;;  %362 = vperm.xlu0 %703, %v356_v16  }
 0x1e8   : > { %v358_v27 = vmul.f32 1.442695, %v357_v17 }
 0x265   : > { %v363_v21 = vpop.permute.xlu0 %362 }
 0x266   : > { %v365_v22 = vsub.f32 %v345_v8, %v363_v21 }
 0x268   : > { %v366_v23 = vmul.f32 1.442695, %v365_v22 }
 0x26a   : > { %705 = vpow2.f32 %v366_v23 }
 0x26b   : > { %707 = vpow2.f32 %v358_v27 }
 0x274   : > { %v706_v24 = vpop.eup %705 }
 0x275   : > { %v370_v25 = vsel %vm352_vm3, %v706_v24, 0.0  ;;  %v383_v26 = vpack.c.bf16 %v706_v24, %v706_v24  ;;  %v708_v28 = vpop.eup %707 }
 0x276   : > { %371 = vadd.xlane.f32.xlu1 %v370_v25  ;;  %v369_v30 = vmul.f32 %v708_v28, %v368_v29 }
 0x277   : > { %624 = vmatmul.mubr.msk.bf16.vlgmr.msra.gmra.mrb[0].mxu1 %vm352_vm3, %v383_v26 }
 0x287   : > { %379 = vperm.xlu1 %704, %v708_v28  }
 0x303   : > { %v372_v31 = vpop.xlane.xlu1 %371 }
 0x304   : > { %v373_v32 = vadd.f32 %v372_v31, %v369_v30 }
 0x306   : > { %375 = vst.msk [vmem:[#allocation3] sm:$0xff] %vm292_vm2, %v373_v32 }
 0x307   : > { %v380_v36 = vpop.permute.xlu1 %379 }
 0x308   : > { %v382_v37 = vmul.f32 %v380_v36, %v376_v35 }
 0x30d   : > { %v437_v33 = vld [vmem:[#allocation3] sm:$0xff] }
 0x30e   : > { %709 = vrcp.f32 %v437_v33 }
 0x318   : > { %v710_v34 = vpop.eup %709 }
 0x319   : > { %442 = vperm.xlu1 %704, %v710_v34  }
 0x34a   : > { %v425_v38 = vpop.f32.mrb[0].mxu1 }
 0x34b   : > { %v431_v39 = vadd.f32 %v425_v38, %v382_v37  ;;  %v625_v40 = vpop.f32.mrb[1].mxu1 }
 0x34c   : > { %v428_v41 = vpop.f32.mrb[2].mxu1 }
 0x34d   : > { %432 = vst.msk [vmem:[#allocation4] sm:$0xff] %vm295_vm0, %v431_v39  ;;  %v626_v42 = vpop.f32.mrb[3].mxu1 }
 0x354   : > { %v439_v43 = vld [vmem:[#allocation4] sm:$0xff] }
 0x398   : > { %v443_v44 = vpop.permute.xlu1 %442 }
 0x399   : > { %v445_v45 = vmul.f32 %v443_v44, %v439_v43 }
 0x39b   : > { %446 = vst.msk [vmem:[%s286_s7] sm:$0xff] %vm295_vm0, %v445_v45 }
 0x39c   : > { %814 = shalt.err (!%p811_p12)
}
 0x39d   : > { %s815_s29 = scalar_lea.hbm %s1142_s9, 128  ;;  %s819_s21 = scalar_lea.hbm %s1194_s3, 1024 }
 0x39e   : > { %p816_p11 = scmp.ne.s32.totalorder %s1142_s9, %s815_s29  ;;  %p820_p6 = scmp.lt.u32.totalorder %s1142_s9, %s1194_s3 }
 0x39f   : > { %p821_p2 = scmp.lt.u32.totalorder %s819_s21, %s815_s29  ;;  %p823_p3 = scmp.lt.u32.totalorder %s815_s29, %s1142_s9 }
 0x3a0   : > { %p817_p5 = pnand %p816_p11, %p1217_p7 }
 0x3a1   : > { %p822_p13 = por %p821_p2, %p820_p6 }
 0x3a2   : > { %p818_p4 = pneg %p817_p5 }
 0x3a3   : > { %p824_p0 = por %p823_p3, %p822_p13 }
 0x3a5   : > { %p825_p1 = pnand %p824_p0, %p818_p4 }
 0x3a7   : > { %828 = shalt.err (!%p825_p1)
}
 0x3a8   : > { %633 = dma.vmem_to_hbm [thread:$0]  (%p1217_p7), %s1144_s20, 128, %s1142_s9, %s448_s22  }
 0x3a9 PF: > { %p650_p8 = scmp.ge.s32.totalorder %s887_s17, 2  ;;  %s474_s16 = sand.u32 1, %s867_s12  }
 0x3aa   : > { %p1218_p9 = scmp.ne.s32.totalorder %s1207_s27, 0  ;;  %s475_s4 = scalar_lea.sflag [#allocation7], %s474_s16 }
 0x3ac   : > { %p646_p10 = pnand %p650_p8, %p1218_p9 }
 0x3ae   : > { %862 = dma.done.wait (!%p646_p10), %s475_s4, 128  }
 0x3af   : > { %864 = vsyncadd (!%p646_p10), %s475_s4, 4294967168  ;;  %s22_s17 = sadd.s32 1, %s887_s17   ;;  %s1219_s25 = sld [smem:[#allocation17_spill]] }
 0x3b0   : > { %p19_p12 = scmp.ge.s32.totalorder %s22_s17, 10   ;;  %s1220_s15 = sld [smem:[#allocation15_spill]] }
 0x3b1   : > { %s1221_s16 = sld [smem:[#allocation16_spill]]  ;;  %s1222_s12 = smov %s871_s13 }
 0x3b2   : > { %s1223_s13 = smov %s875_s14  ;;  %21 = sbr.rel (!%p19_p12) target bundleno = 10 (0xa), region = 109 }
 0x3b5   : > { %s1224_s14 = smov %s1219_s25 }
 0x3b9   :  { %480 = vsyncpa [#allocation6], 1 }
 0x3ba   :  { %482 = vsyncpa [#allocation6 + $0x1], 1 }
 0x3bb   :  { %483 = vsyncpa [#allocation9], 1 }
 0x3bc   :  { %485 = vsyncpa [#allocation9 + $0x1], 1 }
 0x3bd   :  { %486 = vsyncpa [#allocation7], 1 }
 0x3be   :  { %488 = vsyncpa [#allocation7 + $0x1], 1 }

</bundles_post_ra>
